<compile_context>
chip_gen: v5e
topology: v5e:2x2
jax: 0.10.0
libtpu: 0.0.40
codegen_flags: <defaults>
</compile_context>

<pallas_src>
import jax
import jax.numpy as jnp
from jax.experimental import pallas as pl
from jax.experimental.pallas import tpu as pltpu


def _round_up(n, m):
    return (n + m - 1) // m * m


def mlp_kernel(x_ref, w1_ref, shift_ref, w2_ref, b2_ref, o_ref):
    # Cast the activation tile to the weight dtype in-kernel (cheaper than a
    # wrapper-side cast: one f32 HBM read instead of read + write + re-read).
    x = x_ref[...].astype(w1_ref.dtype)
    # fc1 with folded bias/BN: (TB, D) @ (D, Hp) -> f32 accumulation on the MXU.
    h = jnp.dot(x, w1_ref[...], preferred_element_type=jnp.float32)
    # Folded BN/bias shift + ReLU; cast in the same expression so the f32 copy of
    # `h` dies before the second matmul.  Dropout is identity in eval mode.
    h = jnp.maximum(h + shift_ref[...], 0.0).astype(w2_ref.dtype)
    # fc2: (TB, Hp) @ (Hp, O) -> f32 accumulation, then bias.
    o = jnp.dot(h, w2_ref[...], preferred_element_type=jnp.float32)
    o_ref[...] = (o + b2_ref[...]).astype(o_ref.dtype)


def prepare_params(w1, b1, gamma, beta, running_mean, running_var, w2, b2,
                   *, eps=1e-5, compute_dtype=jnp.bfloat16, h_align=None):
    """One-time weight prep: fold fc1 bias + BN into W1'/shift', pad only the
    hidden (contraction) dim H to an MXU-friendly multiple, cast matmul operands
    to the compute dtype.  D (input dim) and O (output dim) are NOT padded, so
    the wrapper never touches the activations.

    Weights are stored transposed vs. PyTorch: W1 is (D, H), W2 is (H, O).
    """
    D, H = w1.shape
    H2, O = w2.shape
    assert H2 == H

    scale = gamma / jnp.sqrt(running_var + eps)          # (H,)
    shift = beta - running_mean * scale                  # (H,)
    w1_folded = w1 * scale[None, :]                      # (D, H)
    shift_folded = b1 * scale + shift                    # (H,)

    if h_align is None:
        # 256x256 MXU on v6e/v7x: prefer 256 alignment once H is big enough.
        h_align = 256 if H >= 256 else 128
    Hp = _round_up(H, h_align)

    # Zero-padded H columns/rows are mathematically inert:
    # h_pad = 0, ReLU(0 + 0) = 0, and the corresponding W2 rows are 0.
    w1_p = jnp.zeros((D, Hp), compute_dtype).at[:, :H].set(
        w1_folded.astype(compute_dtype))
    w2_p = jnp.zeros((Hp, O), compute_dtype).at[:H, :].set(
        w2.astype(compute_dtype))
    shift_p = jnp.zeros((1, Hp), jnp.float32).at[:, :H].set(
        shift_folded.astype(jnp.float32))
    b2_p = b2.astype(jnp.float32).reshape(1, O)

    params = (w1_p, shift_p, w2_p, b2_p)
    dims = (D, H, O, Hp)
    return params, dims


def mlp_forward(x, params, dims, *, block_b=None, out_dtype=None):
    w1_p, shift_p, w2_p, b2_p = params
    D, H, O, Hp = dims
    B = x.shape[0]
    assert x.shape[1] == D

    if out_dtype is None:
        # Emit in the compute dtype (bf16 fast path) -> half the writeback bytes.
        out_dtype = w1_p.dtype

    sublane = 16 if jnp.dtype(w1_p.dtype) == jnp.bfloat16 else 8
    if block_b is None:
        if B <= 512:
            # Single grid step: best for single-TC chips (v5e/v6e); no batch pad.
            block_b = B
        else:
            # Large tiles approach the HBM roofline; B > 512 automatically gives
            # >= 2 "parallel" steps for v7x's two TensorCores.
            block_b = 512
    if block_b != B:
        assert block_b % sublane == 0, "partial batch tiles must be sublane-aligned"

    # Ragged batches: pad B only when necessary (zero rows are inert).
    B_pad = _round_up(B, block_b)
    x_in = x if B_pad == B else jnp.pad(x, ((0, B_pad - B), (0, 0)))

    grid = (B_pad // block_b,)

    w_itemsize = jnp.dtype(w1_p.dtype).itemsize
    x_itemsize = jnp.dtype(x.dtype).itemsize
    o_itemsize = jnp.dtype(out_dtype).itemsize
    flops = 2 * B_pad * D * Hp + 2 * B_pad * Hp * O
    bytes_accessed = (B_pad * D * x_itemsize           # x
                      + D * Hp * w_itemsize            # W1'
                      + Hp * O * w_itemsize            # W2
                      + (Hp + O) * 4                   # shift', b2
                      + B_pad * O * o_itemsize)        # output

    # Estimated VMEM footprint: double-buffered x/out tiles, resident weights
    # (double-buffered by default), f32 intermediate h.  Only set an explicit
    # limit when it exceeds the default scoped VMEM (16 MiB on v5e).
    vmem_est = (2 * block_b * D * x_itemsize
                + 2 * block_b * O * o_itemsize
                + 2 * (D * Hp + Hp * O) * w_itemsize
                + 2 * (Hp + O) * 4
                + block_b * Hp * 4)
    compiler_kwargs = dict(dimension_semantics=("parallel",))
    if vmem_est > (16 << 20):
        compiler_kwargs["vmem_limit_bytes"] = min(int(vmem_est * 5 // 4), 100 << 20)

    out = pl.pallas_call(
        mlp_kernel,
        out_shape=jax.ShapeDtypeStruct((B_pad, O), out_dtype),
        grid_spec=pltpu.PrefetchScalarGridSpec(
            num_scalar_prefetch=0,
            grid=grid,
            in_specs=[
                pl.BlockSpec((block_b, D), lambda i: (i, 0)),   # x tile (full K)
                pl.BlockSpec((D, Hp), lambda i: (0, 0)),        # W1' (resident)
                pl.BlockSpec((1, Hp), lambda i: (0, 0)),        # folded shift
                pl.BlockSpec((Hp, O), lambda i: (0, 0)),        # W2 (resident)
                pl.BlockSpec((1, O), lambda i: (0, 0)),         # b2
            ],
            out_specs=pl.BlockSpec((block_b, O), lambda i: (i, 0)),
        ),
        compiler_params=pltpu.CompilerParams(**compiler_kwargs),
        cost_estimate=pl.CostEstimate(
            flops=flops, transcendentals=0, bytes_accessed=bytes_accessed),
    )(x_in, w1_p, shift_p, w2_p, b2_p)

    # Slice off batch padding only in the ragged case (common case: no-op).
    return out if B_pad == B else out[:B]


def reference_forward(x, w1, b1, gamma, beta, running_mean, running_var, w2, b2,
                      eps=1e-5):
    h = x @ w1 + b1
    h = (h - running_mean) / jnp.sqrt(running_var + eps) * gamma + beta
    h = jnp.maximum(h, 0.0)   # dropout is identity at eval
    return h @ w2 + b2


if __name__ == "__main__":
    B, D, H, O = 16, 64, 128, 32

    key = jax.random.PRNGKey(0)
    k_x, k_w1, k_b1, k_g, k_be, k_m, k_v, k_w2, k_b2 = jax.random.split(key, 9)

    x = jax.random.normal(k_x, (B, D), dtype=jnp.float32)
    # fc1: PyTorch stores (H, D); we store transposed (D, H).
    w1 = jax.random.normal(k_w1, (D, H), dtype=jnp.float32) * 0.1
    b1 = jax.random.normal(k_b1, (H,), dtype=jnp.float32) * 0.1
    # BatchNorm1d parameters and running stats.
    gamma = 1.0 + 0.1 * jax.random.normal(k_g, (H,), dtype=jnp.float32)
    beta = 0.1 * jax.random.normal(k_be, (H,), dtype=jnp.float32)
    running_mean = 0.1 * jax.random.normal(k_m, (H,), dtype=jnp.float32)
    running_var = 1.0 + 0.1 * jax.random.uniform(k_v, (H,), dtype=jnp.float32)
    # fc2: PyTorch stores (O, H); we store transposed (H, O).
    w2 = jax.random.normal(k_w2, (H, O), dtype=jnp.float32) * 0.1
    b2 = jax.random.normal(k_b2, (O,), dtype=jnp.float32) * 0.1

    ref = reference_forward(x, w1, b1, gamma, beta, running_mean, running_var, w2, b2)

    # 1) f32 operands/output: tight numerical check of the folded kernel.
    params_f32, dims_f32 = prepare_params(w1, b1, gamma, beta, running_mean,
                                          running_var, w2, b2,
                                          compute_dtype=jnp.float32)
    out_f32 = jax.block_until_ready(mlp_forward(x, params_f32, dims_f32))
    assert out_f32.shape == (B, O)
    assert jnp.allclose(out_f32, ref, atol=1e-3, rtol=1e-3), "f32 mismatch vs reference"

    # 2) bf16 operands + bf16 output (f32 MXU accumulation): fast path on v6e/v7x.
    params_bf16, dims_bf16 = prepare_params(w1, b1, gamma, beta, running_mean,
                                            running_var, w2, b2,
                                            compute_dtype=jnp.bfloat16)
    out_bf16 = jax.block_until_ready(mlp_forward(x, params_bf16, dims_bf16))
    assert out_bf16.shape == (B, O)
    assert out_bf16.dtype == jnp.bfloat16
    assert jnp.allclose(out_bf16.astype(jnp.float32), ref, atol=6e-2, rtol=6e-2), \
        "bf16 mismatch vs reference"

    # 3) Ragged batch (B not a multiple of block_b): pad-and-slice path.
    Br = 20
    xr = jax.random.normal(jax.random.PRNGKey(1), (Br, D), dtype=jnp.float32)
    ref_r = reference_forward(xr, w1, b1, gamma, beta, running_mean, running_var,
                              w2, b2)
    out_r = jax.block_until_ready(mlp_forward(xr, params_f32, dims_f32, block_b=8))
    assert out_r.shape == (Br, O)
    assert jnp.allclose(out_r, ref_r, atol=1e-3, rtol=1e-3), "ragged-batch mismatch"

    # TODO(synk): training-mode BatchNorm (batch statistics) and stochastic Dropout
    # are not implemented; this kernel matches the module in eval() mode.
    print("KERNEL_OK")
</pallas_src>

<mosaic_0001>
module attributes {stable_mosaic.version = 11 : i64} {
  func.func @mlp_kernel(%arg0: i32, %arg1: memref<16x64xf32, #tpu.memory_space<vmem>>, %arg2: memref<64x128xf32, #tpu.memory_space<vmem>>, %arg3: memref<1x128xf32, #tpu.memory_space<vmem>>, %arg4: memref<128x32xf32, #tpu.memory_space<vmem>>, %arg5: memref<1x32xf32, #tpu.memory_space<vmem>>, %arg6: memref<16x32xf32, #tpu.memory_space<vmem>>) attributes {dimension_semantics = [#tpu.dimension_semantics<parallel>], iteration_bounds = array<i64: 1>, scalar_prefetch = 0 : i64, scratch_operands = 0 : i64, tpu.core_type = #tpu.core_type<tc>, window_params = [{transform_indices = @transform_0, window_bounds = array<i64: 16, 64>}, {pipeline_mode = #tpu.pipeline_mode<synchronous>, transform_indices = @transform_1, window_bounds = array<i64: 64, 128>}, {pipeline_mode = #tpu.pipeline_mode<synchronous>, transform_indices = @transform_2, window_bounds = array<i64: 1, 128>}, {pipeline_mode = #tpu.pipeline_mode<synchronous>, transform_indices = @transform_3, window_bounds = array<i64: 128, 32>}, {pipeline_mode = #tpu.pipeline_mode<synchronous>, transform_indices = @transform_4, window_bounds = array<i64: 1, 32>}, {transform_indices = @transform_5, window_bounds = array<i64: 16, 32>}]} {
    %c0 = arith.constant 0 : index
    %c0_0 = arith.constant 0 : index
    %0 = vector.load %arg1[%c0, %c0_0] : memref<16x64xf32, #tpu.memory_space<vmem>>, vector<16x64xf32>
    %c0_1 = arith.constant 0 : index
    %c0_2 = arith.constant 0 : index
    %1 = vector.load %arg2[%c0_1, %c0_2] : memref<64x128xf32, #tpu.memory_space<vmem>>, vector<64x128xf32>
    %cst = arith.constant dense<0.000000e+00> : vector<16x128xf32>
    %2 = tpu.matmul %0, %1, %cst {dimension_numbers = #tpu.dot_dimension_numbers<[1], [0], [0], [1], [0, 0, 1, 1], [], []>} : vector<16x64xf32>, vector<64x128xf32>, vector<16x128xf32> -> vector<16x128xf32>
    %c0_3 = arith.constant 0 : index
    %c0_4 = arith.constant 0 : index
    %3 = vector.load %arg3[%c0_3, %c0_4] : memref<1x128xf32, #tpu.memory_space<vmem>>, vector<1x128xf32>
    %4 = vector.broadcast %3 : vector<1x128xf32> to vector<16x128xf32>
    %5 = arith.addf %2, %4 : vector<16x128xf32>
    %cst_5 = arith.constant 0.000000e+00 : f32
    %6 = vector.broadcast %cst_5 : f32 to vector<16x128xf32>
    %7 = arith.maximumf %5, %6 : vector<16x128xf32>
    %c0_6 = arith.constant 0 : index
    %c0_7 = arith.constant 0 : index
    %8 = vector.load %arg4[%c0_6, %c0_7] : memref<128x32xf32, #tpu.memory_space<vmem>>, vector<128x32xf32>
    %cst_8 = arith.constant dense<0.000000e+00> : vector<16x32xf32>
    %9 = tpu.matmul %7, %8, %cst_8 {dimension_numbers = #tpu.dot_dimension_numbers<[1], [0], [0], [1], [0, 0, 1, 1], [], []>} : vector<16x128xf32>, vector<128x32xf32>, vector<16x32xf32> -> vector<16x32xf32>
    %c0_9 = arith.constant 0 : index
    %c0_10 = arith.constant 0 : index
    %10 = vector.load %arg5[%c0_9, %c0_10] : memref<1x32xf32, #tpu.memory_space<vmem>>, vector<1x32xf32>
    %11 = vector.broadcast %10 : vector<1x32xf32> to vector<16x32xf32>
    %12 = arith.addf %9, %11 : vector<16x32xf32>
    %c0_11 = arith.constant 0 : index
    %c0_12 = arith.constant 0 : index
    %13 = vector.load %arg6[%c0_11, %c0_12] : memref<16x32xf32, #tpu.memory_space<vmem>>, vector<16x32xf32>
    tpu.vector_store %arg6[%c0_11, %c0_12], %12 {strides = array<i32>} : memref<16x32xf32, #tpu.memory_space<vmem>>, vector<16x32xf32>,
    return
  }
  func.func @transform_0(%arg0: i32) -> (i32, i32) {
    %c0_i32 = arith.constant 0 : i32
    %c0_i32_0 = arith.constant 0 : i32
    return %arg0, %c0_i32 : i32, i32
  }
  func.func @transform_1(%arg0: i32) -> (i32, i32) {
    %c0_i32 = arith.constant 0 : i32
    %c0_i32_0 = arith.constant 0 : i32
    %c0_i32_1 = arith.constant 0 : i32
    return %c0_i32, %c0_i32_0 : i32, i32
  }
  func.func @transform_2(%arg0: i32) -> (i32, i32) {
    %c0_i32 = arith.constant 0 : i32
    %c0_i32_0 = arith.constant 0 : i32
    %c0_i32_1 = arith.constant 0 : i32
    return %c0_i32, %c0_i32_0 : i32, i32
  }
  func.func @transform_3(%arg0: i32) -> (i32, i32) {
    %c0_i32 = arith.constant 0 : i32
    %c0_i32_0 = arith.constant 0 : i32
    %c0_i32_1 = arith.constant 0 : i32
    return %c0_i32, %c0_i32_0 : i32, i32
  }
  func.func @transform_4(%arg0: i32) -> (i32, i32) {
    %c0_i32 = arith.constant 0 : i32
    %c0_i32_0 = arith.constant 0 : i32
    %c0_i32_1 = arith.constant 0 : i32
    return %c0_i32, %c0_i32_0 : i32, i32
  }
  func.func @transform_5(%arg0: i32) -> (i32, i32) {
    %c0_i32 = arith.constant 0 : i32
    %c0_i32_0 = arith.constant 0 : i32
    return %arg0, %c0_i32 : i32, i32
  }
}

</mosaic_0001>

<bundles_post_ra>
// kernel: tpu_custom_call.1
= control target key start
LH: loop header
LB: loop body
LE: loop exit
PB: predicated region body
PF: predicated region fallthrough
CT: control target
= control target key end

     0   :  { %s302_s0 = inlined_call_operand.vmem [shape: f32[16,64], index: 0, kind: input, shape index: {}]   ;;  %s303_s1 = inlined_call_operand.vmem [shape: f32[64,128], index: 1, kind: input, shape index: {}]   ;;  %s304_s2 = inlined_call_operand.vmem [shape: f32[1,128], index: 2, kind: input, shape index: {}]   ;;  %s305_s3 = inlined_call_operand.vmem [shape: f32[128,32], index: 3, kind: input, shape index: {}]   ;;  %s306_s4 = inlined_call_operand.vmem [shape: f32[1,32], index: 4, kind: input, shape index: {}]   ;;  %s307_s5 = inlined_call_operand.hbm [shape: f32[16,32], index: 5, kind: output, shape index: {}]  }
   0x1   :  { %v30_v0 = vld [vmem:[%s303_s1 + $0x38] sm:$0xff]  ;;  %v29_v1 = vld [vmem:[%s303_s1 + $0x30] sm:$0xff]  ;;  %v28_v2 = vld [vmem:[%s303_s1 + $0x28] sm:$0xff] }
   0x2   :  { %50 = vmatpush.msra.mxu0 %v30_v0  ;;  %v82_v3 = vld [vmem:[%s305_s3 + $0x78] sm:$0xff]  ;;  %v81_v4 = vld [vmem:[%s305_s3 + $0x70] sm:$0xff]  ;;  %v27_v5 = vld [vmem:[%s303_s1 + $0x20] sm:$0xff] }
   0x3   :  { %87 = vmatpush.msra.mxu1 %v82_v3  ;;  %133 = vmatpush.msra.mxu2 %v82_v3  ;;  %v80_v6 = vld [vmem:[%s305_s3 + $0x68] sm:$0xff]  ;;  %v26_v7 = vld [vmem:[%s303_s1 + $0x18] sm:$0xff]  ;;  %v79_v8 = vld [vmem:[%s305_s3 + $0x60] sm:$0xff] }
   0x4   :  { %51 = vmatpush.msra.mxu0 %v29_v1  ;;  %v25_v9 = vld [vmem:[%s303_s1 + $0x10] sm:$0xff] }
   0x5   :  { %88 = vmatpush.msra.mxu1 %v81_v4  ;;  %134 = vmatpush.msra.mxu2 %v81_v4 }
   0x6   :  { %52 = vmatpush.msra.mxu0 %v28_v2 }
   0x7   :  { %89 = vmatpush.msra.mxu1 %v80_v6  ;;  %135 = vmatpush.msra.mxu2 %v80_v6 }
   0x8   :  { %53 = vmatpush.msra.mxu0 %v27_v5 }
   0x9   :  { %10 = vsyncpa [#allocation3], 0  ;;  %v78_v10 = vld [vmem:[%s305_s3 + $0x58] sm:$0xff]  ;;  %v24_v11 = vld [vmem:[%s303_s1 + $0x8] sm:$0xff]  ;;  %90 = vmatpush.msra.mxu1 %v79_v8  ;;  %136 = vmatpush.msra.mxu2 %v79_v8  ;;  %vm35_vm0 = vcmask 523264   ;;  %vm110_vm1 = vcmask 261120  }
   0xa   :  { %54 = vmatpush.msra.mxu0 %v26_v7  ;;  %v77_v12 = vld [vmem:[%s305_s3 + $0x50] sm:$0xff]  ;;  %v23_v13 = vld [vmem:[%s303_s1] sm:$0xff]  ;;  %v76_v15 = vld [vmem:[%s305_s3 + $0x48] sm:$0xff]  ;;  %s119_s24 = sshll.u32 %s307_s5, 4  ;;  %s181_s25 = smov 128   ;;  %s120_s24 = int_to_ptr.hbm [resolvable:$true] %s119_s24 }
   0xb   :  { %91 = vmatpush.msra.mxu1 %v78_v10  ;;  %137 = vmatpush.msra.mxu2 %v78_v10  ;;  %v21_v14 = vld [vmem:[%s302_s0] sm:$0xff]  ;;  %v74_v17 = vld [vmem:[%s305_s3 + $0x38] sm:$0xff]  ;;  %v73_v18 = vld [vmem:[%s305_s3 + $0x30] sm:$0xff]  ;;  %s182_s26 = smov 8  }
   0xc   :  { %55 = vmatpush.msra.mxu0 %v25_v9  ;;  %v75_v16 = vld [vmem:[%s305_s3 + $0x40] sm:$0xff]  ;;  %v22_v19 = vld [vmem:[%s302_s0 + $0x8] sm:$0xff]  ;;  %v70_v22 = vld [vmem:[%s305_s3 + $0x18] sm:$0xff] }
   0xd   :  { %92 = vmatpush.msra.mxu1 %v77_v12  ;;  %138 = vmatpush.msra.mxu2 %v77_v12  ;;  %v72_v20 = vld [vmem:[%s305_s3 + $0x28] sm:$0xff]  ;;  %v71_v21 = vld [vmem:[%s305_s3 + $0x20] sm:$0xff]  ;;  %v69_v23 = vld [vmem:[%s305_s3 + $0x10] sm:$0xff] }
   0xe   :  { %56 = vmatpush.msra.mxu0 %v24_v11  ;;  %v68_v24 = vld [vmem:[%s305_s3 + $0x8] sm:$0xff]  ;;  %v67_v25 = vld [vmem:[%s305_s3] sm:$0xff]  ;;  %s180_s3 = smov [#allocation2]  }
   0xf   :  { %93 = vmatpush.msra.mxu1 %v76_v15  ;;  %139 = vmatpush.msra.mxu2 %v76_v15  ;;  %v152_v26 = vld [vmem:[%s304_s2] ss:$0 sm:$0xff]  ;;  %s117_s22 = sshll.u32 %s180_s3, 4  ;;  %s118_s22 = int_to_ptr.vmem [resolvable:$true] %s117_s22 }
  0x10   :  { %57 = vmatpush.msra.mxu0 %v23_v13  ;;  %v153_v33 = vld [vmem:[%s306_s4] ss:$0 sm:$0xff] }
  0x11   :  { %131 = vmatmul.msk.f32.vlgmr.msra.gmra.mxu0 %vm35_vm0, %v21_v14  ;;  %94 = vmatpush.msra.mxu1 %v75_v16 }
  0x12   :  { %140 = vmatpush.msra.mxu2 %v75_v16 }
  0x13   :  { %95 = vmatpush.msra.mxu1 %v74_v17 }
  0x14   :  { %141 = vmatpush.msra.mxu2 %v74_v17 }
  0x15   :  { %96 = vmatpush.msra.mxu1 %v73_v18 }
  0x16   :  { %142 = vmatpush.msra.mxu2 %v73_v18 }
  0x17   :  { %97 = vmatpush.msra.mxu1 %v72_v20 }
  0x18   :  { %143 = vmatpush.msra.mxu2 %v72_v20 }
  0x19   :  { %132 = vmatmul.msk.f32.gmra.mxu0 %vm35_vm0, %v22_v19  ;;  %98 = vmatpush.msra.mxu1 %v71_v21 }
  0x1a   :  { %144 = vmatpush.msra.mxu2 %v71_v21 }
  0x1b   :  { %99 = vmatpush.msra.mxu1 %v70_v22 }
  0x1c   :  { %145 = vmatpush.msra.mxu2 %v70_v22 }
  0x1d   :  { %100 = vmatpush.msra.mxu1 %v69_v23 }
  0x1e   :  { %146 = vmatpush.msra.mxu2 %v69_v23 }
  0x1f   :  { %101 = vmatpush.msra.mxu1 %v68_v24 }
  0x20   :  { %147 = vmatpush.msra.mxu2 %v68_v24 }
  0x21   :  { %102 = vmatpush.msra.mxu1 %v67_v25 }
  0x22   :  { %148 = vmatpush.msra.mxu2 %v67_v25 }
  0x8e   :  { %v59_v27 = vpop.f32.mrf.mxu0 }
  0x8f   :  { %v60_v28 = vadd.f32 %v152_v26, %v59_v27 }
  0x91   :  { %v65_v29 = vmax.f32 %v60_v28, 0.0 }
  0x93   :  { %103 = vmatmul.f32.vlgmr.msra.gmra.mxu1 %v65_v29 }
  0x96   :  { %v62_v30 = vpop.f32.mrf.mxu0 }
  0x97   :  { %v63_v31 = vadd.f32 %v152_v26, %v62_v30 }
  0x99   :  { %v66_v32 = vmax.f32 %v63_v31, 0.0 }
  0x9b   :  { %106 = vmatmul.f32.vlgmr.msra.gmra.mxu2 %v66_v32 }
 0x110   :  { %v104_v34 = vpop.f32.mrf.mxu1 }
 0x111   :  { %v105_v35 = vadd.f32 %v153_v33, %v104_v34 }
 0x113   :  { %111 = vst.msk [vmem:[#allocation2] sm:$0xff] %vm110_vm1, %v105_v35 }
 0x11e   :  { %v107_v36 = vpop.f32.mrf.mxu2 }
 0x11f   :  { %v108_v37 = vadd.f32 %v153_v33, %v107_v36 }
 0x121   :  { %112 = vst.msk [vmem:[#allocation2 + $0x8] sm:$0xff] %vm110_vm1, %v108_v37 }
 0x122   :  { %125 = dma.vmem_to_hbm [thread:$0]  %s118_s22, 256, %s120_s24, [#allocation3], %s181_s25, %s181_s25, %s182_s26  }
 0x123   :  { %178 = dma.done.wait [#allocation3], 256  }
 0x124   :  { %179 = vsyncadd [#allocation3], 4294967040 }
 0x125   :  { %130 = vsyncpa [#allocation3], 1 }

</bundles_post_ra>
